<compile_context>
chip_gen: v6e
topology: v6e:2x2x1
jax: 0.10.0
libtpu: 0.0.40
codegen_flags: <defaults>
</compile_context>

<pallas_src>
import functools

import jax
import jax.numpy as jnp
from jax.experimental import pallas as pl
from jax.experimental.pallas import tpu as pltpu


# --------------------------------------------------------------------------
# Kernels (grid = (B, O-tiles, T-tiles); one (T_t, O_t) output block per step)
# --------------------------------------------------------------------------
def _make_expand_kernel(E, C, Di):
    """x is already dispatched: per-batch block (E*C, Di)."""

    def kernel(x_ref, w_ref, b_ref, comb_ref, o_ref, y_ref):
        # x_ref:(E*C,Di) bf16   w_ref:(E*Di,tO) bf16   b_ref:(1,tO) f32
        # comb_ref:(tT,E*C) bf16   o_ref:(tT,tO)   y_ref:(E*C,tO) bf16 scratch
        @pl.when(pl.program_id(2) == 0)            # first T-tile of this (b, o)
        def _build_y():
            for e in range(E):                     # unrolled; E is small
                x_e = x_ref[e * C:(e + 1) * C, :]          # (C, Di)   sublane slice
                w_e = w_ref[e * Di:(e + 1) * Di, :]        # (Di, tO)  128-aligned
                y_ref[e * C:(e + 1) * C, :] = jnp.dot(     # K = Di
                    x_e, w_e, preferred_element_type=jnp.float32
                ).astype(y_ref.dtype)

        comb = comb_ref[...]
        s = jnp.sum(comb.astype(jnp.float32), axis=1, keepdims=True)   # (tT, 1)
        out = jnp.dot(comb, y_ref[...],                                 # K = E*C
                      preferred_element_type=jnp.float32)
        o_ref[...] = (out + s * b_ref[...]).astype(o_ref.dtype)

    return kernel


def _make_dispatch_expand_kernel(E, C, Di):
    """x token-major (Tin, E*Di), dm pre-transposed to (E*C, Tin)."""

    def kernel(x_ref, dm_ref, w_ref, b_ref, comb_ref, o_ref, y_ref):
        @pl.when(pl.program_id(2) == 0)            # first T-tile of this (b, o)
        def _build_y():
            for e in range(E):
                dm_e = dm_ref[e * C:(e + 1) * C, :]        # (C, Tin)  sublane slice
                x_e = x_ref[:, e * Di:(e + 1) * Di]        # (Tin, Di) 128-aligned
                xd_e = jnp.dot(dm_e, x_e,                  # (C, Di), K = Tin
                               preferred_element_type=jnp.float32)
                w_e = w_ref[e * Di:(e + 1) * Di, :]        # (Di, tO)
                y_ref[e * C:(e + 1) * C, :] = jnp.dot(     # K = Di
                    xd_e.astype(w_ref.dtype), w_e,
                    preferred_element_type=jnp.float32).astype(y_ref.dtype)

        comb = comb_ref[...]
        s = jnp.sum(comb.astype(jnp.float32), axis=1, keepdims=True)
        out = jnp.dot(comb, y_ref[...], preferred_element_type=jnp.float32)
        o_ref[...] = (out + s * b_ref[...]).astype(o_ref.dtype)

    return kernel


# --------------------------------------------------------------------------
# Wrapper
# --------------------------------------------------------------------------
def _pick_tile(n, preferred):
    """Largest multiple-of-128 tile <= preferred dividing n, else full n."""
    if n <= preferred:
        return n
    t = preferred
    while t >= 128:
        if n % t == 0:
            return t
        t -= 128
    return n


@functools.partial(jax.jit, static_argnames=("num_experts",))
def experts_choose_masked_expand(x, weight, combine_array, bias,
                                 dispatch_mask=None, *, num_experts):
    """Mirrors the PyTorch function (bias path; bias is required here)."""
    if bias is None:
        # TODO(synk): the bias=False branch of the reference uses a malformed
        # 'bt...' einsum (sums out the output-feature axis); not implemented.
        raise NotImplementedError("bias=None path is not implemented")

    E = num_experts
    O, In = weight.shape
    assert In % E == 0, "in_features must be divisible by num_experts"
    Di = In // E
    B = x.shape[0]
    T = combine_array.shape[1]
    C = combine_array.shape[3]

    out_dtype = jnp.result_type(x.dtype, weight.dtype)
    mx = jnp.bfloat16                               # MXU operand dtype
    esize = jnp.dtype(mx).itemsize
    osize = jnp.dtype(out_dtype).itemsize

    # One-time param transform following torch's row-major reshape:
    #   w_eff[e*Di + i, o] = weight.reshape(E, O, Di)[e, o, i]
    w_eff = jnp.transpose(weight.reshape(E, O, Di), (0, 2, 1)) \
               .reshape(In, O).astype(mx)
    bias2 = bias.astype(jnp.float32).reshape(1, O)
    comb2 = combine_array.reshape(B, T, E * C).astype(mx)   # free collapse

    tT = _pick_tile(T, 256)
    tO = _pick_tile(O, 512)
    nT, nO = T // tT, O // tO
    grid = (B, nO, nT)
    sem = ("parallel", "parallel", "arbitrary")

    out_shape = jax.ShapeDtypeStruct((B, T, O), out_dtype)
    out_spec = pl.BlockSpec((None, tT, tO), lambda b, o, t: (b, t, o))
    w_spec = pl.BlockSpec((In, tO), lambda b, o, t: (0, o))
    bias_spec = pl.BlockSpec((1, tO), lambda b, o, t: (0, o))
    comb_spec = pl.BlockSpec((None, tT, E * C), lambda b, o, t: (b, t, 0))
    scratch = [pltpu.VMEM((E * C, tO), mx)]

    if dispatch_mask is None:
        assert x.shape == (B, E, C, Di)
        x2 = x.reshape(B, E * C, Di).astype(mx)              # free collapse
        kernel = _make_expand_kernel(E, C, Di)
        x_spec = pl.BlockSpec((None, E * C, Di), lambda b, o, t: (b, 0, 0))

        blk_bytes = (E * C * Di + In * tO + tT * E * C) * esize \
            + tO * 4 + tT * tO * osize
        vmem_limit = int(min(max(2 * blk_bytes + E * C * tO * esize + (8 << 20),
                                 32 << 20), 64 << 20))
        flops = B * (2 * E * C * Di * O + 2 * T * E * C * O)
        bytes_accessed = esize * (x2.size + comb2.size + B * nO * In * tO) \
            + 4 * bias.size + osize * B * T * O

        return pl.pallas_call(
            kernel,
            out_shape=out_shape,
            grid=grid,
            in_specs=[x_spec, w_spec, bias_spec, comb_spec],
            out_specs=out_spec,
            scratch_shapes=scratch,
            compiler_params=pltpu.CompilerParams(
                dimension_semantics=sem, vmem_limit_bytes=vmem_limit),
            cost_estimate=pl.CostEstimate(
                flops=flops, transcendentals=0, bytes_accessed=bytes_accessed),
        )(x2, w_eff, bias2, comb2)

    # ---- dispatch path: fuse dispatch into the same kernel ----
    x2 = x.reshape(B, -1, In).astype(mx)                     # (B, Tin, E*Di)
    Tin = x2.shape[1]
    assert dispatch_mask.shape == (B, Tin, E, C)
    # Transpose so per-expert dm slices are aligned sublane slices in-kernel.
    dm2 = jnp.transpose(dispatch_mask, (0, 2, 3, 1)) \
             .reshape(B, E * C, Tin).astype(mx)
    kernel = _make_dispatch_expand_kernel(E, C, Di)
    x_spec = pl.BlockSpec((None, Tin, In), lambda b, o, t: (b, 0, 0))
    dm_spec = pl.BlockSpec((None, E * C, Tin), lambda b, o, t: (b, 0, 0))

    blk_bytes = (Tin * In + E * C * Tin + In * tO + tT * E * C) * esize \
        + tO * 4 + tT * tO * osize
    vmem_limit = int(min(max(2 * blk_bytes + E * C * tO * esize + (8 << 20),
                             32 << 20), 64 << 20))
    flops = B * (nO * 2 * E * C * Tin * Di + 2 * E * C * Di * O
                 + 2 * T * E * C * O)
    bytes_accessed = esize * (x2.size + dm2.size + comb2.size
                              + B * nO * In * tO) + 4 * bias.size \
        + osize * B * T * O

    return pl.pallas_call(
        kernel,
        out_shape=out_shape,
        grid=grid,
        in_specs=[x_spec, dm_spec, w_spec, bias_spec, comb_spec],
        out_specs=out_spec,
        scratch_shapes=scratch,
        compiler_params=pltpu.CompilerParams(
            dimension_semantics=sem, vmem_limit_bytes=vmem_limit),
        cost_estimate=pl.CostEstimate(
            flops=flops, transcendentals=0, bytes_accessed=bytes_accessed),
    )(x2, dm2, w_eff, bias2, comb2)


# --------------------------------------------------------------------------
# Pure-JAX reference (mirrors the torch einsums) for verification
# --------------------------------------------------------------------------
def _reference(x, weight, combine, bias, dispatch_mask, num_experts):
    O, In = weight.shape
    Di = In // num_experts
    w = weight.reshape(num_experts, O, Di)           # torch row-major reshape
    if dispatch_mask is not None:
        x = x.reshape(x.shape[0], -1, num_experts, Di)
        x = jnp.einsum('btei,btec->beci', x, dispatch_mask)
    x_homo = jnp.concatenate([x, jnp.ones_like(x[..., :1])], axis=-1)
    b_col = jnp.broadcast_to(bias.reshape(1, O), (num_experts, O))[..., None]
    w_homo = jnp.concatenate([w, b_col], axis=-1)
    return jnp.einsum('beci,eoi,btec->bto', x_homo, w_homo, combine)


if __name__ == "__main__":
    # Small, deterministic problem:
    B, T, E, C = 2, 8, 4, 8
    Di = 128                     # expert_in_features
    IN = E * Di                  # in_features = 512
    OUT = 128                    # out_features

    key = jax.random.PRNGKey(0)
    k_w, k_b, k_x, k_c, k_xd, k_dm = jax.random.split(key, 6)

    # deterministic "nn.Linear(in_features, out_features)" parameters
    weight = jax.random.normal(k_w, (OUT, IN), dtype=jnp.float32) * 0.05
    bias = jax.random.normal(k_b, (OUT,), dtype=jnp.float32) * 0.1

    # --- path 1: dispatch_mask=None (x already dispatched: (B, E, C, Di)) ---
    x = jax.random.normal(k_x, (B, E, C, Di), dtype=jnp.float32)
    combine = jax.random.normal(k_c, (B, T, E, C), dtype=jnp.float32) * 0.1

    out = experts_choose_masked_expand(x, weight, combine, bias, num_experts=E)
    out = jax.block_until_ready(out)
    ref = _reference(x, weight, combine, bias, None, E)
    assert out.shape == (B, T, OUT)
    # bf16 matmul operands with f32 accumulation -> relaxed tolerance
    assert jnp.allclose(out.astype(jnp.float32), ref, rtol=2e-2, atol=2e-2), \
        "mismatch (no dispatch mask)"

    # --- path 2: with dispatch_mask (dispatch fused into the same kernel) ---
    x_d = jax.random.normal(k_xd, (B, T, E, Di), dtype=jnp.float32)
    dispatch_mask = (jax.random.uniform(k_dm, (B, T, E, C)) > 0.5).astype(jnp.float32)

    out_d = experts_choose_masked_expand(x_d, weight, combine, bias,
                                         dispatch_mask, num_experts=E)
    out_d = jax.block_until_ready(out_d)
    ref_d = _reference(x_d, weight, combine, bias, dispatch_mask, E)
    assert out_d.shape == (B, T, OUT)
    assert jnp.allclose(out_d.astype(jnp.float32), ref_d, rtol=2e-2, atol=2e-2), \
        "mismatch (dispatch mask)"

    print("KERNEL_OK")
</pallas_src>

<mosaic_0001>
module attributes {stable_mosaic.version = 11 : i64} {
  func.func @kernel(%arg0: i32, %arg1: i32, %arg2: i32, %arg3: memref<1x32x128xbf16, #tpu.memory_space<vmem>>, %arg4: memref<512x128xbf16, #tpu.memory_space<vmem>>, %arg5: memref<1x128xf32, #tpu.memory_space<vmem>>, %arg6: memref<1x8x32xbf16, #tpu.memory_space<vmem>>, %arg7: memref<1x8x128xf32, #tpu.memory_space<vmem>>, %arg8: memref<32x128xbf16, #tpu.memory_space<vmem>>) attributes {dimension_semantics = [#tpu.dimension_semantics<parallel>, #tpu.dimension_semantics<parallel>, #tpu.dimension_semantics<arbitrary>], iteration_bounds = array<i64: 2, 1, 1>, scalar_prefetch = 0 : i64, scratch_operands = 1 : i64, tpu.core_type = #tpu.core_type<tc>, window_params = [{transform_indices = @transform_0, window_bounds = array<i64: 1, 32, 128>}, {transform_indices = @transform_1, window_bounds = array<i64: 512, 128>}, {transform_indices = @transform_2, window_bounds = array<i64: 1, 128>}, {transform_indices = @transform_3, window_bounds = array<i64: 1, 8, 32>}, {transform_indices = @transform_4, window_bounds = array<i64: 1, 8, 128>}]} {
    %c0_i32 = arith.constant 0 : i32
    %0 = arith.cmpi eq, %arg2, %c0_i32 : i32
    %1 = arith.extui %0 : i1 to i32
    %c0_i32_0 = arith.constant 0 : i32
    %2 = arith.cmpi ne, %1, %c0_i32_0 : i32
    scf.if %2 {
      %c0_11 = arith.constant 0 : index
      %c0_12 = arith.constant 0 : index
      %c0_13 = arith.constant 0 : index
      %18 = vector.load %arg3[%c0_11, %c0_12, %c0_13] : memref<1x32x128xbf16, #tpu.memory_space<vmem>>, vector<1x8x128xbf16>
      %19 = vector.shape_cast %18 : vector<1x8x128xbf16> to vector<8x128xbf16>
      %c0_14 = arith.constant 0 : index
      %c0_15 = arith.constant 0 : index
      %20 = vector.load %arg4[%c0_14, %c0_15] : memref<512x128xbf16, #tpu.memory_space<vmem>>, vector<128x128xbf16>
      %cst_16 = arith.constant dense<0.000000e+00> : vector<8x128xf32>
      %21 = tpu.matmul %19, %20, %cst_16 {dimension_numbers = #tpu.dot_dimension_numbers<[1], [0], [0], [1], [0, 0, 1, 1], [], []>} : vector<8x128xbf16>, vector<128x128xbf16>, vector<8x128xf32> -> vector<8x128xf32>
      %22 = arith.truncf %21 : vector<8x128xf32> to vector<8x128xbf16>
      %c0_17 = arith.constant 0 : index
      %c0_18 = arith.constant 0 : index
      %23 = vector.load %arg8[%c0_17, %c0_18] : memref<32x128xbf16, #tpu.memory_space<vmem>>, vector<8x128xbf16>
      tpu.vector_store %arg8[%c0_17, %c0_18], %22 {strides = array<i32>} : memref<32x128xbf16, #tpu.memory_space<vmem>>, vector<8x128xbf16>,
      %c0_19 = arith.constant 0 : index
      %c8 = arith.constant 8 : index
      %c0_20 = arith.constant 0 : index
      %24 = vector.load %arg3[%c0_19, %c8, %c0_20] : memref<1x32x128xbf16, #tpu.memory_space<vmem>>, vector<1x8x128xbf16>
      %25 = vector.shape_cast %24 : vector<1x8x128xbf16> to vector<8x128xbf16>
      %c128 = arith.constant 128 : index
      %c0_21 = arith.constant 0 : index
      %26 = vector.load %arg4[%c128, %c0_21] : memref<512x128xbf16, #tpu.memory_space<vmem>>, vector<128x128xbf16>
      %cst_22 = arith.constant dense<0.000000e+00> : vector<8x128xf32>
      %27 = tpu.matmul %25, %26, %cst_22 {dimension_numbers = #tpu.dot_dimension_numbers<[1], [0], [0], [1], [0, 0, 1, 1], [], []>} : vector<8x128xbf16>, vector<128x128xbf16>, vector<8x128xf32> -> vector<8x128xf32>
      %28 = arith.truncf %27 : vector<8x128xf32> to vector<8x128xbf16>
      %c8_23 = arith.constant 8 : index
      %c0_24 = arith.constant 0 : index
      %29 = vector.load %arg8[%c8_23, %c0_24] : memref<32x128xbf16, #tpu.memory_space<vmem>>, vector<8x128xbf16>
      tpu.vector_store %arg8[%c8_23, %c0_24], %28 {strides = array<i32>} : memref<32x128xbf16, #tpu.memory_space<vmem>>, vector<8x128xbf16>,
      %c0_25 = arith.constant 0 : index
      %c16 = arith.constant 16 : index
      %c0_26 = arith.constant 0 : index
      %30 = vector.load %arg3[%c0_25, %c16, %c0_26] : memref<1x32x128xbf16, #tpu.memory_space<vmem>>, vector<1x8x128xbf16>
      %31 = vector.shape_cast %30 : vector<1x8x128xbf16> to vector<8x128xbf16>
      %c256 = arith.constant 256 : index
      %c0_27 = arith.constant 0 : index
      %32 = vector.load %arg4[%c256, %c0_27] : memref<512x128xbf16, #tpu.memory_space<vmem>>, vector<128x128xbf16>
      %cst_28 = arith.constant dense<0.000000e+00> : vector<8x128xf32>
      %33 = tpu.matmul %31, %32, %cst_28 {dimension_numbers = #tpu.dot_dimension_numbers<[1], [0], [0], [1], [0, 0, 1, 1], [], []>} : vector<8x128xbf16>, vector<128x128xbf16>, vector<8x128xf32> -> vector<8x128xf32>
      %34 = arith.truncf %33 : vector<8x128xf32> to vector<8x128xbf16>
      %c16_29 = arith.constant 16 : index
      %c0_30 = arith.constant 0 : index
      %35 = vector.load %arg8[%c16_29, %c0_30] : memref<32x128xbf16, #tpu.memory_space<vmem>>, vector<8x128xbf16>
      tpu.vector_store %arg8[%c16_29, %c0_30], %34 {strides = array<i32>} : memref<32x128xbf16, #tpu.memory_space<vmem>>, vector<8x128xbf16>,
      %c0_31 = arith.constant 0 : index
      %c24 = arith.constant 24 : index
      %c0_32 = arith.constant 0 : index
      %36 = vector.load %arg3[%c0_31, %c24, %c0_32] : memref<1x32x128xbf16, #tpu.memory_space<vmem>>, vector<1x8x128xbf16>
      %37 = vector.shape_cast %36 : vector<1x8x128xbf16> to vector<8x128xbf16>
      %c384 = arith.constant 384 : index
      %c0_33 = arith.constant 0 : index
      %38 = vector.load %arg4[%c384, %c0_33] : memref<512x128xbf16, #tpu.memory_space<vmem>>, vector<128x128xbf16>
      %cst_34 = arith.constant dense<0.000000e+00> : vector<8x128xf32>
      %39 = tpu.matmul %37, %38, %cst_34 {dimension_numbers = #tpu.dot_dimension_numbers<[1], [0], [0], [1], [0, 0, 1, 1], [], []>} : vector<8x128xbf16>, vector<128x128xbf16>, vector<8x128xf32> -> vector<8x128xf32>
      %40 = arith.truncf %39 : vector<8x128xf32> to vector<8x128xbf16>
      %c24_35 = arith.constant 24 : index
      %c0_36 = arith.constant 0 : index
      %41 = vector.load %arg8[%c24_35, %c0_36] : memref<32x128xbf16, #tpu.memory_space<vmem>>, vector<8x128xbf16>
      tpu.vector_store %arg8[%c24_35, %c0_36], %40 {strides = array<i32>} : memref<32x128xbf16, #tpu.memory_space<vmem>>, vector<8x128xbf16>,
    } else {
    }
    %c0 = arith.constant 0 : index
    %c0_1 = arith.constant 0 : index
    %c0_2 = arith.constant 0 : index
    %3 = vector.load %arg6[%c0, %c0_1, %c0_2] : memref<1x8x32xbf16, #tpu.memory_space<vmem>>, vector<1x8x32xbf16>
    %4 = vector.shape_cast %3 : vector<1x8x32xbf16> to vector<8x32xbf16>
    %5 = arith.extf %4 : vector<8x32xbf16> to vector<8x32xf32>
    %cst = arith.constant dense<0.000000e+00> : vector<8xf32>
    %6 = vector.multi_reduction <add>, %5, %cst [1] : vector<8x32xf32> to vector<8xf32>
    %7 = vector.shape_cast %6 : vector<8xf32> to vector<8x1xf32>
    %c0_3 = arith.constant 0 : index
    %c0_4 = arith.constant 0 : index
    %8 = vector.load %arg8[%c0_3, %c0_4] : memref<32x128xbf16, #tpu.memory_space<vmem>>, vector<32x128xbf16>
    %cst_5 = arith.constant dense<0.000000e+00> : vector<8x128xf32>
    %9 = tpu.matmul %4, %8, %cst_5 {dimension_numbers = #tpu.dot_dimension_numbers<[1], [0], [0], [1], [0, 0, 1, 1], [], []>} : vector<8x32xbf16>, vector<32x128xbf16>, vector<8x128xf32> -> vector<8x128xf32>
    %c0_6 = arith.constant 0 : index
    %c0_7 = arith.constant 0 : index
    %10 = vector.load %arg5[%c0_6, %c0_7] : memref<1x128xf32, #tpu.memory_space<vmem>>, vector<1x128xf32>
    %11 = vector.broadcast %7 : vector<8x1xf32> to vector<8x128xf32>
    %12 = vector.broadcast %10 : vector<1x128xf32> to vector<8x128xf32>
    %13 = arith.mulf %11, %12 : vector<8x128xf32>
    %14 = arith.addf %9, %13 : vector<8x128xf32>
    %c0_8 = arith.constant 0 : index
    %c0_9 = arith.constant 0 : index
    %c0_10 = arith.constant 0 : index
    %15 = vector.load %arg7[%c0_8, %c0_9, %c0_10] : memref<1x8x128xf32, #tpu.memory_space<vmem>>, vector<1x8x128xf32>
    %16 = vector.shape_cast %15 : vector<1x8x128xf32> to vector<8x128xf32>
    %17 = vector.shape_cast %14 : vector<8x128xf32> to vector<1x8x128xf32>
    tpu.vector_store %arg7[%c0_8, %c0_9, %c0_10], %17 {strides = array<i32>} : memref<1x8x128xf32, #tpu.memory_space<vmem>>, vector<1x8x128xf32>,
    return
  }
  func.func @transform_0(%arg0: i32, %arg1: i32, %arg2: i32) -> (i32, i32, i32) {
    %c0_i32 = arith.constant 0 : i32
    %c0_i32_0 = arith.constant 0 : i32
    %c0_i32_1 = arith.constant 0 : i32
    return %arg0, %c0_i32, %c0_i32_0 : i32, i32, i32
  }
  func.func @transform_1(%arg0: i32, %arg1: i32, %arg2: i32) -> (i32, i32) {
    %c0_i32 = arith.constant 0 : i32
    %c0_i32_0 = arith.constant 0 : i32
    return %c0_i32, %arg1 : i32, i32
  }
  func.func @transform_2(%arg0: i32, %arg1: i32, %arg2: i32) -> (i32, i32) {
    %c0_i32 = arith.constant 0 : i32
    %c0_i32_0 = arith.constant 0 : i32
    return %c0_i32, %arg1 : i32, i32
  }
  func.func @transform_3(%arg0: i32, %arg1: i32, %arg2: i32) -> (i32, i32, i32) {
    %c0_i32 = arith.constant 0 : i32
    %c0_i32_0 = arith.constant 0 : i32
    return %arg0, %arg2, %c0_i32 : i32, i32, i32
  }
  func.func @transform_4(%arg0: i32, %arg1: i32, %arg2: i32) -> (i32, i32, i32) {
    %c0_i32 = arith.constant 0 : i32
    return %arg0, %arg2, %arg1 : i32, i32, i32
  }
}

</mosaic_0001>

<bundles_post_ra>
// kernel: experts_choose_masked_expand.1
= control target key start
LH: loop header
LB: loop body
LE: loop exit
PB: predicated region body
PF: predicated region fallthrough
CT: control target
= control target key end

     0   :  { %9 = vsyncpa [#allocation4], 0  ;;  %s1560_s0 = inlined_call_operand.vmem [shape: bf16[2,32,128], index: 0, kind: input, shape index: {}]   ;;  %s1561_s1 = inlined_call_operand.vmem [shape: bf16[512,128], index: 1, kind: input, shape index: {}]   ;;  %s1562_s2 = inlined_call_operand.vmem [shape: f32[1,128], index: 2, kind: input, shape index: {}]   ;;  %s1563_s3 = inlined_call_operand.vmem [shape: bf16[2,8,32], index: 3, kind: input, shape index: {}]   ;;  %s1564_s4 = inlined_call_operand.hbm [shape: f32[2,8,128], index: 4, kind: output, shape index: {}]  }
   0x1   :  { %11 = vsyncpa [#allocation4 + $0x1], 0  ;;  %s1291_s15 = smov 0   ;;  %s1293_s16 = smov 0  }
   0x2   :  { %s1295_s17 = smov 0   ;;  %s1297_s18 = smov 0  }
   0x3   :  { %s1299_s19 = smov 0   ;;  %s1301_s20 = smov 0  }
   0x4 LB: > { %s915_s21 = sadd.s32 4294967295, %s1261_s20   ;;  %s916_s22 = sadd.s32 4294967294, %s1261_s20   ;;  %s1261_s20 = sphi %s1301_s20, %s17_s20   ;;  %s1257_s19 = sphi %s1299_s19, %s1571_s19   ;;  %s1253_s18 = sphi %s1297_s18, %s1570_s18   ;;  %s1249_s17 = sphi %s1295_s17, %s1569_s17   ;;  %s1245_s16 = sphi %s1293_s16, %s1568_s16   ;;  %s1241_s15 = sphi %s1291_s15, %s1567_s15  }
   0x5   : > { %s36_s23 = sadd.s32 1, %s1257_s19  ;;  %s153_s24 = sadd.s32 1, %s1249_s17 }
   0x6   : > { %p38_p0 = scmp.ge.s32.totalorder %s36_s23, 2  ;;  %p163_p1 = scmp.ne.s32.totalorder %s1249_s17, %s1245_s16 }
   0x7   : > { %p164_p2 = scmp.eq.s32.totalorder %s915_s21, 1  ;;  %p169_p3 = scmp.ne.s32.totalorder %s1245_s16, %s1241_s15 }
   0x8   : > { %s1573_s23 = smov (%p38_p0, %s36_s23), 0  ;;  %p170_p5 = scmp.eq.s32.totalorder %s916_s22, 1 }
   0x9   : > { %p1331_p4 = por %p164_p2, %p163_p1  ;;  %s146_s26 = ssub.s32 %s1257_s19, %s1573_s23 }
   0xa   : > { %p921_p6 = scmp.ge.s32.totalorder %s1261_s20, 1  ;;  %p151_p7 = scmp.eq.s32.totalorder %s146_s26, 0 }
   0xb   : > { %p1338_p8 = por %p170_p5, %p169_p3  ;;  %p219_p9 = scmp.lt.s32.totalorder %s1261_s20, 3 }
   0xc   : > { %s1344_s28 = scalar_select %p151_p7, %s1249_s17, %s153_s24  }
   0xd   : > { %p220_p10 = pnand %p921_p6, %p219_p9 }
   0xe   : > { %p259_p11 = scmp.lt.s32.totalorder (!%p220_p10), %s1253_s18, 1  ;;  %s963_s30 = sshll.u32 (!%p220_p10), %s1253_s18, 7 }
   0xf   : > { %223 = sbr.rel (%p220_p10) target bundleno = 505 (0x1f9), region = 36  ;;  %s1514_s10 = scalar_lea.hbm (!%p220_p10), %s1564_s4, %s963_s30 }
  0x14   : > { %v1151_v0 = vld [vmem:[%s1561_s1 + $0x38] sm:$0xff]   ;;  %v1263_v1 = vmov 0.0   ;;  %v1153_v3 = vld [vmem:[%s1561_s1 + $0x30] sm:$0xff]   ;;  %vm1264_vm0 = vmmov 0   ;;  %v1155_v5 = vld [vmem:[%s1561_s1 + $0x28] sm:$0xff]   ;;  %s1395_s9 = scalar_select %p259_p11, %s1253_s18, 1 }
  0x15   : > { %1006 = vmatprep.subr.bf16.mxu0 %v1263_v1  ;;  %1026 = vmatprep.subr.bf16.mxu1 %v1263_v1  ;;  %v1152_v2 = vld [vmem:[%s1561_s1 + $0x78] sm:$0xff]   ;;  %v1154_v4 = vld [vmem:[%s1561_s1 + $0x70] sm:$0xff]   ;;  %v1156_v6 = vld [vmem:[%s1561_s1 + $0x68] sm:$0xff]   ;;  %vm713_vm1 = vcmask 261120   ;;  %s1265_s18 = smov [#allocation3]  }
  0x16   : > { %1007 = vmatpush3.bf16.msra.mxu0 %v1151_v0  ;;  %1022 = vmatprep.mubr.msk.bf16.mxu0 %vm1264_vm0, %v1263_v1  ;;  %v1157_v7 = vld [vmem:[%s1561_s1 + $0x20] sm:$0xff]   ;;  %v1159_v9 = vld [vmem:[%s1561_s1 + $0x18] sm:$0xff]   ;;  %v1161_v11 = vld [vmem:[%s1561_s1 + $0x10] sm:$0xff]   ;;  %s966_s14 = sshll.u32 %s1395_s9, 4  ;;  %s925_s13 = sshll.u32 %s1395_s9, 2 }
  0x17   : > { %1027 = vmatpush3.bf16.msra.mxu1 %v1152_v2  ;;  %1008 = vmatprep.subr.bf16.mxu0 %v1263_v1  ;;  %v1158_v8 = vld [vmem:[%s1561_s1 + $0x60] sm:$0xff]   ;;  %v1160_v10 = vld [vmem:[%s1561_s1 + $0x58] sm:$0xff]   ;;  %v1162_v12 = vld [vmem:[%s1561_s1 + $0x50] sm:$0xff]   ;;  %s1414_s29 = scalar_lea.vmem %s1560_s0, %s966_s14  ;;  %s277_s22 = scalar_lea.vmem %s1563_s3, %s925_s13 }
  0x18   : > { %1028 = vmatprep.subr.bf16.mxu1 %v1263_v1  ;;  %1042 = vmatprep.mubr.msk.bf16.mxu1 %vm1264_vm0, %v1263_v1  ;;  %v1163_v13 = vld [vmem:[%s1561_s1 + $0x8] sm:$0xff]   ;;  %v1165_v15 = vld [vmem:[%s1561_s1] sm:$0xff]   ;;  %v1167_v19 = vld [vmem:[%s1561_s1 + $0xb8] sm:$0xff]   ;;  %s256_s9 = sand.u32 1, %s1245_s16   ;;  %s1189_s13 = sshll.u32 %s1265_s18, 4  ;;  %s1190_s13 = int_to_ptr.vmem [resolvable:$false] %s1189_s13 }
  0x19   : > { %v1164_v14 = vld [vmem:[%s1561_s1 + $0x48] sm:$0xff]   ;;  %v1166_v16 = vld [vmem:[%s1561_s1 + $0x40] sm:$0xff]   ;;  %v1168_v20 = vld [vmem:[%s1561_s1 + $0xf8] sm:$0xff]   ;;  %s786_s11 = scalar_lea.sflag [#allocation4], %s256_s9  ;;  %s1191_s14 = scalar_lea.vmem %s1190_s13, 256 }
  0x1a   : > { %1009 = vmatpush3.bf16.msra.mxu0 %v1153_v3  ;;  %v283_v17 = vld [vmem:[%s1414_s29] sm:$0xf]  ;;  %v390_v18 = vld [vmem:[%s1414_s29 + $0x4] sm:$0xf]  ;;  %v1169_v21 = vld [vmem:[%s1561_s1 + $0xb0] sm:$0xff]  }
  0x1b   : > { %1029 = vmatpush3.bf16.msra.mxu1 %v1154_v4  ;;  %1010 = vmatprep.subr.bf16.mxu0 %v1263_v1  ;;  %v1170_v22 = vld [vmem:[%s1561_s1 + $0xf0] sm:$0xff]   ;;  %v1171_v23 = vld [vmem:[%s1561_s1 + $0xa8] sm:$0xff]   ;;  %v1173_v25 = vld [vmem:[%s1561_s1 + $0xa0] sm:$0xff]  }
  0x1c   : > { %1030 = vmatprep.subr.bf16.mxu1 %v1263_v1  ;;  %v1172_v24 = vld [vmem:[%s1561_s1 + $0xe8] sm:$0xff]   ;;  %v1174_v26 = vld [vmem:[%s1561_s1 + $0xe0] sm:$0xff]   ;;  %v1175_v27 = vld [vmem:[%s1561_s1 + $0x98] sm:$0xff]  }
  0x1d   : > { %v1176_v28 = vld [vmem:[%s1561_s1 + $0xd8] sm:$0xff]   ;;  %v1177_v29 = vld [vmem:[%s1561_s1 + $0x90] sm:$0xff]   ;;  %v1179_v31 = vld [vmem:[%s1561_s1 + $0x88] sm:$0xff]  }
  0x1e   : > { %1011 = vmatpush3.bf16.msra.mxu0 %v1155_v5  ;;  %v1178_v30 = vld [vmem:[%s1561_s1 + $0xd0] sm:$0xff]   ;;  %v1180_v32 = vld [vmem:[%s1561_s1 + $0xc8] sm:$0xff]   ;;  %v1181_v33 = vld [vmem:[%s1561_s1 + $0x80] sm:$0xff]  }
  0x1f   : > { %1031 = vmatpush3.bf16.msra.mxu1 %v1156_v6  ;;  %1012 = vmatprep.subr.bf16.mxu0 %v1263_v1  ;;  %v1182_v34 = vld [vmem:[%s1561_s1 + $0xc0] sm:$0xff]   ;;  %v497_v35 = vld [vmem:[%s1414_s29 + $0x8] sm:$0xf]  ;;  %v604_v36 = vld [vmem:[%s1414_s29 + $0xc] sm:$0xf]  ;;  %s922_s29 = sshll.u32 %s256_s9, 3 }
  0x20   : > { %1032 = vmatprep.subr.bf16.mxu1 %v1263_v1  ;;  %v711_v37 = vld [vmem:[%s277_s22] sm:$0xf]  ;;  %s258_s5 = scalar_lea.vmem [#allocation3], %s922_s29 }
  0x21   : > { %v712_v38 = vunpack.c.l.bf16 %v711_v37  ;;  %v958_v63 = vld [vmem:[%s1562_s2] ss:$0 sm:$0xff]  ;;  %s801_s6 = sshll.u32 %s258_s5, 4  ;;  %s1516_s6 = int_to_ptr.vmem [resolvable:$true] %s801_s6 }
  0x22   : > { %1013 = vmatpush3.bf16.msra.mxu0 %v1157_v7  ;;  %s1185_s12 = scalar_lea.vmem %s1516_s6, 128  ;;  %p1192_p1 = scmp.lt.s32.totalorder %s1516_s6, %s1190_s13 }
  0x23   : > { %1033 = vmatpush3.bf16.msra.mxu1 %v1158_v8  ;;  %1014 = vmatprep.subr.bf16.mxu0 %v1263_v1  ;;  %v714_v39 = vsel %vm713_vm1, %v712_v38, 0.0  ;;  %p1186_p12 = scmp.ne.s32.totalorder %s1516_s6, %s1185_s12  ;;  %p1193_p2 = scmp.lt.s32.totalorder %s1191_s14, %s1185_s12 }
  0x24   : > { %1034 = vmatprep.subr.bf16.mxu1 %v1263_v1  ;;  %715 = vadd.xlane.f32.xlu0 %v714_v39 }
  0x25   : > { %p1187_p13 = pnand %p1186_p12, %p1331_p4  ;;  %p1194_p3 = por %p1193_p2, %p1192_p1 }
  0x26   : > { %1015 = vmatpush3.bf16.msra.mxu0 %v1159_v9 }
  0x27   : > { %1035 = vmatpush3.bf16.msra.mxu1 %v1160_v10  ;;  %1016 = vmatprep.subr.bf16.mxu0 %v1263_v1  ;;  %p1188_p0 = pneg %p1187_p13 }
  0x28   : > { %1036 = vmatprep.subr.bf16.mxu1 %v1263_v1 }
  0x29   : > { %p1195_p5 = pnand %p1194_p3, %p1188_p0 }
  0x2a   : > { %1017 = vmatpush3.bf16.msra.mxu0 %v1161_v11 }
  0x2b   : > { %1037 = vmatpush3.bf16.msra.mxu1 %v1162_v12  ;;  %1018 = vmatprep.subr.bf16.mxu0 %v1263_v1 }
  0x2c   : > { %1038 = vmatprep.subr.bf16.mxu1 %v1263_v1 }
  0x2e   : > { %1019 = vmatpush3.bf16.msra.mxu0 %v1163_v13 }
  0x2f   : > { %1039 = vmatpush3.bf16.msra.mxu1 %v1164_v14  ;;  %1020 = vmatprep.subr.bf16.mxu0 %v1263_v1 }
  0x30   : > { %1040 = vmatprep.subr.bf16.mxu1 %v1263_v1 }
  0x32   : > { %1021 = vmatpush3.bf16.msra.mxu0 %v1165_v15 }
  0x33   : > { %1041 = vmatpush3.bf16.msra.mxu1 %v1166_v16  ;;  %1046 = vmatprep.subr.bf16.mxu0 %v1263_v1 }
  0x34   : > { %1066 = vmatprep.subr.bf16.mxu1 %v1263_v1 }
  0x35   : > { %1023 = vmatmul.mubr.bf16.vlgmr.msra.gmra.mxu0 %v283_v17 }
  0x36   : > { %1043 = vmatmul.mubr.bf16.vlgmr.msra.gmra.mxu1 %v390_v18  ;;  %1047 = vmatpush3.bf16.msra.mxu0 %v1167_v19 }
  0x37   : > { %1067 = vmatpush3.bf16.msra.mxu1 %v1168_v20  ;;  %1048 = vmatprep.subr.bf16.mxu0 %v1263_v1 }
  0x38   : > { %1068 = vmatprep.subr.bf16.mxu1 %v1263_v1  ;;  %1062 = vmatprep.mubr.msk.bf16.mxu0 %vm1264_vm0, %v1263_v1 }
  0x39   : > { %1082 = vmatprep.mubr.msk.bf16.mxu1 %vm1264_vm0, %v1263_v1 }
  0x3a   : > { %1049 = vmatpush3.bf16.msra.mxu0 %v1169_v21 }
  0x3b   : > { %1069 = vmatpush3.bf16.msra.mxu1 %v1170_v22  ;;  %1050 = vmatprep.subr.bf16.mxu0 %v1263_v1 }
  0x3c   : > { %1070 = vmatprep.subr.bf16.mxu1 %v1263_v1 }
  0x3e   : > { %1051 = vmatpush3.bf16.msra.mxu0 %v1171_v23 }
  0x3f   : > { %1071 = vmatpush3.bf16.msra.mxu1 %v1172_v24  ;;  %1052 = vmatprep.subr.bf16.mxu0 %v1263_v1 }
  0x40   : > { %1072 = vmatprep.subr.bf16.mxu1 %v1263_v1 }
  0x42   : > { %1053 = vmatpush3.bf16.msra.mxu0 %v1173_v25 }
  0x43   : > { %1073 = vmatpush3.bf16.msra.mxu1 %v1174_v26  ;;  %1054 = vmatprep.subr.bf16.mxu0 %v1263_v1 }
  0x44   : > { %1074 = vmatprep.subr.bf16.mxu1 %v1263_v1 }
  0x46   : > { %1055 = vmatpush3.bf16.msra.mxu0 %v1175_v27 }
  0x47   : > { %1075 = vmatpush3.bf16.msra.mxu1 %v1176_v28  ;;  %1056 = vmatprep.subr.bf16.mxu0 %v1263_v1 }
  0x48   : > { %1076 = vmatprep.subr.bf16.mxu1 %v1263_v1 }
  0x4a   : > { %1057 = vmatpush3.bf16.msra.mxu0 %v1177_v29 }
  0x4b   : > { %1077 = vmatpush3.bf16.msra.mxu1 %v1178_v30  ;;  %1058 = vmatprep.subr.bf16.mxu0 %v1263_v1 }
  0x4c   : > { %1078 = vmatprep.subr.bf16.mxu1 %v1263_v1 }
  0x4e   : > { %1059 = vmatpush3.bf16.msra.mxu0 %v1179_v31 }
  0x4f   : > { %1079 = vmatpush3.bf16.msra.mxu1 %v1180_v32  ;;  %1060 = vmatprep.subr.bf16.mxu0 %v1263_v1 }
  0x50   : > { %1080 = vmatprep.subr.bf16.mxu1 %v1263_v1 }
  0x52   : > { %1061 = vmatpush3.bf16.msra.mxu0 %v1181_v33 }
  0x53   : > { %1081 = vmatpush3.bf16.msra.mxu1 %v1182_v34  ;;  %1086 = vmatprep.subr.bf16.mxu0 %v1263_v1 }
  0x55   : > { %1063 = vmatmul.mubr.bf16.vlgmr.msra.gmra.mxu0 %v497_v35 }
  0x56   : > { %1083 = vmatmul.mubr.bf16.vlgmr.msra.gmra.mxu1 %v604_v36  ;;  %1090 = vmatprep.mubr.msk.bf16.mxu0 %vm1264_vm0, %v1263_v1 }
  0xad   : > { %v716_v62 = vpop.xlane.xlu0 %715 }
  0xae   : > { %v728_v0 = vmul.f32 %v958_v63, %v716_v62 }
  0xf5   : > { %v382_v40 = vpop.f32.mrf.mxu0 }
  0xf6   : > { %v388_v41 = vpack.c.bf16 %v382_v40, %v382_v40  ;;  %v489_v42 = vpop.f32.mrf.mxu1 }
  0xf7   : > { %v495_v43 = vpack.c.bf16 %v489_v42, %v489_v42  ;;  %v1024_v44 = vpop.f32.mrf.mxu0 }
  0xf8   : > { %389 = vst [vmem:[#allocation2] sm:$0xf] %v388_v41  ;;  %v1044_v45 = vpop.f32.mrf.mxu1 }
  0xf9   : > { %496 = vst [vmem:[#allocation2 + $0x4] sm:$0xf] %v495_v43  ;;  %v385_v46 = vpop.f32.mrf.mxu0 }
  0xfa   : > { %v492_v47 = vpop.f32.mrf.mxu1 }
  0xfb   : > { %v1025_v48 = vpop.f32.mrf.mxu0 }
  0xfc   : > { %v1045_v49 = vpop.f32.mrf.mxu1 }
 0x100   : > { %v1184_v61 = vld [vmem:[#allocation2] sm:$0xff]  }
 0x115   : > { %v596_v50 = vpop.f32.mrf.mxu0 }
 0x116   : > { %v602_v51 = vpack.c.bf16 %v596_v50, %v596_v50  ;;  %v703_v52 = vpop.f32.mrf.mxu1 }
 0x117   : > { %v709_v53 = vpack.c.bf16 %v703_v52, %v703_v52  ;;  %v1064_v54 = vpop.f32.mrf.mxu0 }
 0x118   : > { %603 = vst [vmem:[#allocation2 + $0x8] sm:$0xf] %v602_v51  ;;  %v1084_v55 = vpop.f32.mrf.mxu1 }
 0x119   : > { %710 = vst [vmem:[#allocation2 + $0xc] sm:$0xf] %v709_v53  ;;  %v599_v56 = vpop.f32.mrf.mxu0 }
 0x11a   : > { %v706_v57 = vpop.f32.mrf.mxu1 }
 0x11b   : > { %v1065_v58 = vpop.f32.mrf.mxu0 }
 0x11c   : > { %v1085_v59 = vpop.f32.mrf.mxu1 }
 0x120   : > { %v1183_v60 = vld [vmem:[#allocation2 + $0x8] sm:$0xff]  }
 0x121   : > { %1087 = vmatpush3.bf16.msra.mxu0 %v1183_v60 }
 0x122   : > { %1088 = vmatprep.subr.bf16.mxu0 %v1263_v1 }
 0x125   : > { %1089 = vmatpush3.bf16.msra.mxu0 %v1184_v61 }
 0x128   : > { %1091 = vmatmul.mubr.msk.bf16.vlgmr.msra.gmra.mxu0 %vm713_vm1, %v711_v37 }
 0x1e8   : > { %v778_v2 = vpop.f32.mrf.mxu0 }
 0x1e9   : > { %v779_v3 = vadd.f32 %v778_v2, %v728_v0 }
 0x1ea   : > { %v1092_v1 = vpop.f32.mrf.mxu0 }
 0x1eb   : > { %784 = vst [vmem:[%s258_s5] sm:$0xff] %v779_v3 }
 0x1ec   : > { %v781_v4 = vpop.f32.mrf.mxu0 }
 0x1ed   : > { %1198 = shalt.err (!%p1195_p5)
}
 0x1ee   : > { %s1199_s21 = scalar_lea.hbm %s1514_s10, 128  ;;  %s1203_s29 = scalar_lea.hbm %s1564_s4, 256 }
 0x1ef   : > { %p1200_p6 = scmp.ne.s32.totalorder %s1514_s10, %s1199_s21  ;;  %p1204_p10 = scmp.lt.s32.totalorder %s1514_s10, %s1564_s4 }
 0x1f0   : > { %p1205_p11 = scmp.lt.s32.totalorder %s1203_s29, %s1199_s21 }
 0x1f1   : > { %p1201_p7 = pnand %p1200_p6, %p1331_p4 }
 0x1f2   : > { %p1206_p12 = por %p1205_p11, %p1204_p10 }
 0x1f3   : > { %p1202_p9 = pneg %p1201_p7 }
 0x1f5   : > { %p1207_p13 = pnand %p1206_p12, %p1202_p9 }
 0x1f7   : > { %1210 = shalt.err (!%p1207_p13)
}
 0x1f8   : > { %1094 = dma.vmem_to_hbm [thread:$0]  (%p1331_p4), %s1516_s6, 128, %s1514_s10, %s786_s11   ;;  %v1093_v5 = vpop.f32.mrf.mxu0 }
 0x1f9 PF: > { %p1100_p0 = scmp.ge.s32.totalorder %s1261_s20, 2  ;;  %s813_s30 = sand.u32 1, %s1241_s15  }
 0x1fa   : > { %s814_s5 = scalar_lea.sflag [#allocation4], %s813_s30 }
 0x1fb   : > { %p1097_p1 = pnand %p1100_p0, %p1338_p8 }
 0x1fd   : > { %p1098_p2 = pneg %p1097_p1 }
 0x1ff   : > { %1236 = dma.done.wait (%p1098_p2), %s814_s5, 128  }
 0x200   : > { %1238 = vsyncadd (%p1098_p2), %s814_s5, 4294967168  ;;  %s17_s20 = sadd.s32 1, %s1261_s20   ;;  %s1567_s15 = smov %s1245_s16 }
 0x201   : > { %p14_p3 = scmp.ge.s32.totalorder %s17_s20, 4   ;;  %s1568_s16 = smov %s1249_s17 }
 0x202   : > { %s1569_s17 = smov %s1344_s28  ;;  %s1570_s18 = smov %s1257_s19 }
 0x203   : > { %s1571_s19 = smov %s1573_s23  ;;  %16 = sbr.rel (!%p14_p3) target bundleno = 4 (0x4), region = 84 }
 0x208   :  { %819 = vsyncpa [#allocation4], 1 }
 0x209   :  { %821 = vsyncpa [#allocation4 + $0x1], 1 }

</bundles_post_ra>
